<compile_context>
chip_gen: v7x
topology: tpu7x:2x2x1
jax: 0.10.0
libtpu: 0.0.40
codegen_flags: <defaults>
</compile_context>

<pallas_src>
import math

import numpy as np
import jax
import jax.numpy as jnp
from jax import lax
from jax.experimental import pallas as pl
from jax.experimental.pallas import tpu as pltpu

LANE = 128     # pad every feature dim to the 128-lane vreg width
TM_MAX = 512   # rows per M-tile (f32 in+out, double buffered -> ~1 MiB, fits all gens)


def _mix32(x):
    """lowbias32 integer hash, uint32 -> uint32 (pure elementwise VPU ops)."""
    x = x ^ (x >> 16)
    x = x * np.uint32(0x7FEB352D)
    x = x ^ (x >> 15)
    x = x * np.uint32(0x846CA68B)
    x = x ^ (x >> 16)
    return x


# ----------------------------------------------------------------------------
# Fused Prenet kernel (one M-tile per grid step).  For each layer l:
#   h = where(keep_l, relu(h @ W2_l), 0)        with W2_l = 2 * W_l (prepacked)
# which equals dropout(relu(h @ W_l), p=0.5, training=True) with inverted scaling.
# ----------------------------------------------------------------------------
def prenet_kernel(seed_ref, x_ref, w_ref, out_ref):
    # seed_ref: (1,)  int32, scalar-prefetched into SMEM
    # x_ref:    (TM, LANE)       f32 activation tile (feature dim zero-padded)
    # w_ref:    (L, LANE, LANE)  bf16 prepacked weights, resident across all tiles
    # out_ref:  (TM, LANE)       f32 output tile
    tm = x_ref.shape[0]
    num_layers = w_ref.shape[0]

    seed_u = seed_ref[0].astype(jnp.uint32)
    tile_u = pl.program_id(0).astype(jnp.uint32)

    # Global element index -> dropout mask is independent of tiling / execution order.
    row = lax.broadcasted_iota(jnp.uint32, (tm, LANE), 0)
    col = lax.broadcasted_iota(jnp.uint32, (tm, LANE), 1)
    idx = (tile_u * np.uint32(tm) + row) * np.uint32(LANE) + col

    h = x_ref[...]
    for l in range(num_layers):  # static & tiny -> fully unrolled
        # bf16 MXU feed, f32 accumulate.
        acc = jnp.dot(h.astype(jnp.bfloat16), w_ref[l],
                      preferred_element_type=jnp.float32)
        acc = jnp.maximum(acc, 0.0)                                   # ReLU (f32)
        # Bernoulli(0.5) keep-mask from a counter hash; 2x scale is folded into W.
        salt = np.uint32(((l + 1) * 0x9E3779B1) & 0xFFFFFFFF)
        bits = _mix32(idx ^ salt ^ (seed_u * np.uint32(0x85EBCA6B)))
        keep = (bits & np.uint32(1)) == np.uint32(1)
        h = jnp.where(keep, acc, 0.0)                                 # dropout, always on
    out_ref[...] = h


# ----------------------------------------------------------------------------
# One-time weight prepack: pad to (128,128), fold the 1/(1-p)=2 dropout scale,
# stack, cast to bf16.  Do NOT call this per forward.
# ----------------------------------------------------------------------------
def prepack_prenet_weights(weights):
    """weights: list of (in_l, out_l) f32 arrays in x @ W layout."""
    padded = []
    for w in weights:
        wi, wo = w.shape
        # TODO(synk): tile the K/N dims for real Tacotron2 dims (80->256->256) > 128.
        assert wi <= LANE and wo <= LANE, "this demo packs each layer into one 128x128 tile"
        wp = jnp.zeros((LANE, LANE), jnp.float32).at[:wi, :wo].set(
            w.astype(jnp.float32) * 2.0)  # fold 1/(1-0.5); exact since ReLU(2x)=2*ReLU(x)
        padded.append(wp)
    return jnp.stack(padded, axis=0).astype(jnp.bfloat16)  # (L, 128, 128)


# ----------------------------------------------------------------------------
# Wrapper: flatten batch/time into M, pad to lane-dense shapes, run one fused
# pallas_call over an M-tiled grid, un-pad.
# Callers should pass a fresh `seed` per step for independent dropout masks.
# ----------------------------------------------------------------------------
def prenet_forward(x, w_stack, out_dim, seed=0):
    lead = x.shape[:-1]
    in_dim = x.shape[-1]
    num_layers = w_stack.shape[0]

    m = int(np.prod(lead)) if lead else 1
    m8 = -(-m // 8) * 8                 # round rows up to the 8-sublane multiple
    tm = min(TM_MAX, m8)                # tile height
    m_pad = -(-m // tm) * tm            # round rows up to a whole number of tiles
    grid = (m_pad // tm,)

    x2 = x.reshape(m, in_dim).astype(jnp.float32)
    x_p = jnp.pad(x2, ((0, m_pad - m), (0, LANE - in_dim)))

    seed_arr = jnp.array([seed], dtype=jnp.int32)

    out = pl.pallas_call(
        prenet_kernel,
        out_shape=jax.ShapeDtypeStruct((m_pad, LANE), jnp.float32),
        grid_spec=pltpu.PrefetchScalarGridSpec(
            num_scalar_prefetch=1,               # seed -> SMEM
            grid=grid,
            in_specs=[
                pl.BlockSpec((tm, LANE), lambda i, s: (i, 0)),                 # activations
                pl.BlockSpec((num_layers, LANE, LANE), lambda i, s: (0, 0, 0)),  # weights, resident
            ],
            out_specs=pl.BlockSpec((tm, LANE), lambda i, s: (i, 0)),
        ),
        compiler_params=pltpu.CompilerParams(
            dimension_semantics=("parallel",),   # megacore on v7x; harmless on v5e/v6e
        ),
    )(seed_arr, x_p, w_stack)

    return out[:m, :out_dim].reshape(*lead, out_dim)


# ----------------------------------------------------------------------------
# Parameter init mirroring LinearNorm: xavier_uniform_ with gain('linear')=1,
# bias=False.  Weights stored transposed ((in, out)) for x @ W.
# ----------------------------------------------------------------------------
def init_prenet_weights(key, in_dim, sizes):
    in_sizes = [in_dim] + sizes[:-1]
    keys = jax.random.split(key, len(sizes))
    weights = []
    for k, din, dout in zip(keys, in_sizes, sizes):
        bound = math.sqrt(6.0 / (din + dout))  # xavier_uniform_, gain=1
        weights.append(jax.random.uniform(k, (din, dout), jnp.float32, -bound, bound))
    return weights


if __name__ == "__main__":
    key = jax.random.PRNGKey(0)
    kx, kw = jax.random.split(key)

    B, T = 2, 16
    IN_DIM = 32
    SIZES = [32, 32]  # Prenet(in_dim=32, sizes=[32, 32]) — scaled-down Tacotron2 prenet

    x = jax.random.normal(kx, (B, T, IN_DIM), dtype=jnp.float32)
    weights = init_prenet_weights(kw, IN_DIM, SIZES)
    w_stack = prepack_prenet_weights(weights)   # one-time prepack (padded, x2, bf16)

    out = prenet_forward(x, w_stack, out_dim=SIZES[-1], seed=0)
    out = jax.block_until_ready(out)

    assert out.shape == (B, T, SIZES[-1]), out.shape
    assert bool(jnp.all(jnp.isfinite(out)))
    assert bool(jnp.all(out >= 0.0))  # relu -> dropout keeps non-negativity
    print("KERNEL_OK")
</pallas_src>

<mosaic_0001>
module attributes {stable_mosaic.version = 11 : i64} {
  func.func @prenet_kernel(%arg0: i32, %arg1: memref<1xi32, #tpu.memory_space<smem>>, %arg2: memref<32x128xf32, #tpu.memory_space<vmem>>, %arg3: memref<2x128x128xbf16, #tpu.memory_space<vmem>>, %arg4: memref<32x128xf32, #tpu.memory_space<vmem>>) attributes {dimension_semantics = [#tpu.dimension_semantics<parallel>], iteration_bounds = array<i64: 1>, scalar_prefetch = 1 : i64, scratch_operands = 0 : i64, tpu.core_type = #tpu.core_type<tc>, window_params = [{transform_indices = @transform_0, window_bounds = array<i64: 32, 128>}, {pipeline_mode = #tpu.pipeline_mode<synchronous>, transform_indices = @transform_1, window_bounds = array<i64: 2, 128, 128>}, {transform_indices = @transform_2, window_bounds = array<i64: 32, 128>}]} {
    %c0 = arith.constant 0 : index
    %0 = memref.load %arg1[%c0] : memref<1xi32, #tpu.memory_space<smem>>
    %1 = tpu.iota {dimensions = array<i32: 0>} : vector<32x128xi32>
    %2 = tpu.iota {dimensions = array<i32: 1>} : vector<32x128xi32>
    %c32_i32 = arith.constant 32 : i32
    %3 = arith.muli %arg0, %c32_i32 : i32
    %4 = vector.broadcast %3 : i32 to vector<32x128xi32>
    %5 = arith.addi %4, %1 : vector<32x128xi32>
    %c128_i32 = arith.constant 128 : i32
    %6 = vector.broadcast %c128_i32 : i32 to vector<32x128xi32>
    %7 = arith.muli %5, %6 : vector<32x128xi32>
    %8 = arith.addi %7, %2 : vector<32x128xi32>
    %c0_0 = arith.constant 0 : index
    %c0_1 = arith.constant 0 : index
    %9 = vector.load %arg2[%c0_0, %c0_1] : memref<32x128xf32, #tpu.memory_space<vmem>>, vector<32x128xf32>
    %10 = arith.truncf %9 : vector<32x128xf32> to vector<32x128xbf16>
    %c0_2 = arith.constant 0 : index
    %c0_3 = arith.constant 0 : index
    %c0_4 = arith.constant 0 : index
    %11 = vector.load %arg3[%c0_2, %c0_3, %c0_4] : memref<2x128x128xbf16, #tpu.memory_space<vmem>>, vector<1x128x128xbf16>
    %12 = vector.shape_cast %11 : vector<1x128x128xbf16> to vector<128x128xbf16>
    %cst = arith.constant dense<0.000000e+00> : vector<32x128xf32>
    %13 = tpu.matmul %10, %12, %cst {dimension_numbers = #tpu.dot_dimension_numbers<[1], [0], [0], [1], [0, 0, 1, 1], [], []>} : vector<32x128xbf16>, vector<128x128xbf16>, vector<32x128xf32> -> vector<32x128xf32>
    %cst_5 = arith.constant 0.000000e+00 : f32
    %14 = vector.broadcast %cst_5 : f32 to vector<32x128xf32>
    %15 = arith.maximumf %13, %14 : vector<32x128xf32>
    %c-1640531535_i32 = arith.constant -1640531535 : i32
    %16 = vector.broadcast %c-1640531535_i32 : i32 to vector<32x128xi32>
    %17 = arith.xori %8, %16 : vector<32x128xi32>
    %c-2048144789_i32 = arith.constant -2048144789 : i32
    %18 = arith.muli %0, %c-2048144789_i32 : i32
    %19 = vector.broadcast %18 : i32 to vector<32x128xi32>
    %20 = arith.xori %17, %19 : vector<32x128xi32>
    %c16_i32 = arith.constant 16 : i32
    %21 = vector.broadcast %c16_i32 : i32 to vector<32x128xi32>
    %22 = arith.shrui %20, %21 : vector<32x128xi32>
    %23 = arith.xori %20, %22 : vector<32x128xi32>
    %c2146121005_i32 = arith.constant 2146121005 : i32
    %24 = vector.broadcast %c2146121005_i32 : i32 to vector<32x128xi32>
    %25 = arith.muli %23, %24 : vector<32x128xi32>
    %c15_i32 = arith.constant 15 : i32
    %26 = vector.broadcast %c15_i32 : i32 to vector<32x128xi32>
    %27 = arith.shrui %25, %26 : vector<32x128xi32>
    %28 = arith.xori %25, %27 : vector<32x128xi32>
    %c-2073254261_i32 = arith.constant -2073254261 : i32
    %29 = vector.broadcast %c-2073254261_i32 : i32 to vector<32x128xi32>
    %30 = arith.muli %28, %29 : vector<32x128xi32>
    %c16_i32_6 = arith.constant 16 : i32
    %31 = vector.broadcast %c16_i32_6 : i32 to vector<32x128xi32>
    %32 = arith.shrui %30, %31 : vector<32x128xi32>
    %33 = arith.xori %30, %32 : vector<32x128xi32>
    %c1_i32 = arith.constant 1 : i32
    %34 = vector.broadcast %c1_i32 : i32 to vector<32x128xi32>
    %35 = arith.andi %33, %34 : vector<32x128xi32>
    %c1_i32_7 = arith.constant 1 : i32
    %36 = vector.broadcast %c1_i32_7 : i32 to vector<32x128xi32>
    %37 = arith.cmpi eq, %35, %36 : vector<32x128xi32>
    %cst_8 = arith.constant 0.000000e+00 : f32
    %38 = vector.broadcast %cst_8 : f32 to vector<32x128xf32>
    %39 = arith.select %37, %15, %38 : vector<32x128xi1>, vector<32x128xf32>
    %40 = arith.truncf %39 : vector<32x128xf32> to vector<32x128xbf16>
    %c1 = arith.constant 1 : index
    %c0_9 = arith.constant 0 : index
    %c0_10 = arith.constant 0 : index
    %41 = vector.load %arg3[%c1, %c0_9, %c0_10] : memref<2x128x128xbf16, #tpu.memory_space<vmem>>, vector<1x128x128xbf16>
    %42 = vector.shape_cast %41 : vector<1x128x128xbf16> to vector<128x128xbf16>
    %cst_11 = arith.constant dense<0.000000e+00> : vector<32x128xf32>
    %43 = tpu.matmul %40, %42, %cst_11 {dimension_numbers = #tpu.dot_dimension_numbers<[1], [0], [0], [1], [0, 0, 1, 1], [], []>} : vector<32x128xbf16>, vector<128x128xbf16>, vector<32x128xf32> -> vector<32x128xf32>
    %cst_12 = arith.constant 0.000000e+00 : f32
    %44 = vector.broadcast %cst_12 : f32 to vector<32x128xf32>
    %45 = arith.maximumf %43, %44 : vector<32x128xf32>
    %c1013904226_i32 = arith.constant 1013904226 : i32
    %46 = vector.broadcast %c1013904226_i32 : i32 to vector<32x128xi32>
    %47 = arith.xori %8, %46 : vector<32x128xi32>
    %c-2048144789_i32_13 = arith.constant -2048144789 : i32
    %48 = arith.muli %0, %c-2048144789_i32_13 : i32
    %49 = vector.broadcast %48 : i32 to vector<32x128xi32>
    %50 = arith.xori %47, %49 : vector<32x128xi32>
    %c16_i32_14 = arith.constant 16 : i32
    %51 = vector.broadcast %c16_i32_14 : i32 to vector<32x128xi32>
    %52 = arith.shrui %50, %51 : vector<32x128xi32>
    %53 = arith.xori %50, %52 : vector<32x128xi32>
    %c2146121005_i32_15 = arith.constant 2146121005 : i32
    %54 = vector.broadcast %c2146121005_i32_15 : i32 to vector<32x128xi32>
    %55 = arith.muli %53, %54 : vector<32x128xi32>
    %c15_i32_16 = arith.constant 15 : i32
    %56 = vector.broadcast %c15_i32_16 : i32 to vector<32x128xi32>
    %57 = arith.shrui %55, %56 : vector<32x128xi32>
    %58 = arith.xori %55, %57 : vector<32x128xi32>
    %c-2073254261_i32_17 = arith.constant -2073254261 : i32
    %59 = vector.broadcast %c-2073254261_i32_17 : i32 to vector<32x128xi32>
    %60 = arith.muli %58, %59 : vector<32x128xi32>
    %c16_i32_18 = arith.constant 16 : i32
    %61 = vector.broadcast %c16_i32_18 : i32 to vector<32x128xi32>
    %62 = arith.shrui %60, %61 : vector<32x128xi32>
    %63 = arith.xori %60, %62 : vector<32x128xi32>
    %c1_i32_19 = arith.constant 1 : i32
    %64 = vector.broadcast %c1_i32_19 : i32 to vector<32x128xi32>
    %65 = arith.andi %63, %64 : vector<32x128xi32>
    %c1_i32_20 = arith.constant 1 : i32
    %66 = vector.broadcast %c1_i32_20 : i32 to vector<32x128xi32>
    %67 = arith.cmpi eq, %65, %66 : vector<32x128xi32>
    %cst_21 = arith.constant 0.000000e+00 : f32
    %68 = vector.broadcast %cst_21 : f32 to vector<32x128xf32>
    %69 = arith.select %67, %45, %68 : vector<32x128xi1>, vector<32x128xf32>
    %c0_22 = arith.constant 0 : index
    %c0_23 = arith.constant 0 : index
    %70 = vector.load %arg4[%c0_22, %c0_23] : memref<32x128xf32, #tpu.memory_space<vmem>>, vector<32x128xf32>
    tpu.vector_store %arg4[%c0_22, %c0_23], %69 {strides = array<i32>} : memref<32x128xf32, #tpu.memory_space<vmem>>, vector<32x128xf32>,
    return
  }
  func.func @transform_0(%arg0: i32, %arg1: memref<1xi32, #tpu.memory_space<smem>>) -> (i32, i32) {
    %c0_i32 = arith.constant 0 : i32
    %c0_i32_0 = arith.constant 0 : i32
    return %arg0, %c0_i32 : i32, i32
  }
  func.func @transform_1(%arg0: i32, %arg1: memref<1xi32, #tpu.memory_space<smem>>) -> (i32, i32, i32) {
    %c0_i32 = arith.constant 0 : i32
    %c0_i32_0 = arith.constant 0 : i32
    %c0_i32_1 = arith.constant 0 : i32
    %c0_i32_2 = arith.constant 0 : i32
    return %c0_i32, %c0_i32_0, %c0_i32_1 : i32, i32, i32
  }
  func.func @transform_2(%arg0: i32, %arg1: memref<1xi32, #tpu.memory_space<smem>>) -> (i32, i32) {
    %c0_i32 = arith.constant 0 : i32
    %c0_i32_0 = arith.constant 0 : i32
    return %arg0, %c0_i32 : i32, i32
  }
}

</mosaic_0001>

<bundles_post_ra>
// kernel: tpu_custom_call.1
= control target key start
LH: loop header
LB: loop body
LE: loop exit
PB: predicated region body
PF: predicated region fallthrough
CT: control target
= control target key end

     0   :  { %9 = vsyncpa [#allocation5], 0  ;;  %s711_s0 = inlined_call_operand.<no memory space> [shape: s32[1], index: 0, kind: input, shape index: {}]   ;;  %s712_s1 = inlined_call_operand.hbm [shape: f32[32,128], index: 1, kind: input, shape index: {}]   ;;  %s713_s2 = inlined_call_operand.hbm [shape: bf16[2,128,128], index: 2, kind: input, shape index: {}]   ;;  %s714_s3 = inlined_call_operand.hbm [shape: f32[32,128], index: 3, kind: output, shape index: {}]  }
   0x1   :  { %10 = vsyncpa [#allocation8], 0 }
   0x2   :  { %11 = vsyncpa [#allocation6], 0  ;;  %s613_s12 = smov [#allocation4]   ;;  %s541_s16 = scalar_lea.hbm %s712_s1, 512 }
   0x3   :  { %s17_s13 = sshll.u32 %s613_s12, 4  ;;  %p542_p0 = scmp.ne.s32.totalorder %s712_s1, %s541_s16  ;;  %s18_s13 = int_to_ptr.vmem [resolvable:$true] %s17_s13 }
   0x4   :  { %p545_p1 = scmp.lt.u32.totalorder %s541_s16, %s712_s1 }
   0x6   :  { %p547_p2 = pnand %p545_p1, %p542_p0 }
   0x8   :  { %550 = shalt.err (!%p547_p2)
}
   0x9   :  { %s551_s21 = scalar_lea.vmem %s18_s13, 512  ;;  %p556_p4 = scmp.lt.s32.totalorder %s18_s13, %s18_s13 }
   0xa   :  { %p552_p3 = scmp.ne.s32.totalorder %s18_s13, %s551_s21  ;;  %p557_p5 = scmp.lt.s32.totalorder %s551_s21, %s551_s21 }
   0xc   :  { %p558_p6 = por %p557_p5, %p556_p4 }
   0xe   :  { %p559_p7 = pnand %p558_p6, %p552_p3 }
  0x10   :  { %562 = shalt.err (!%p559_p7)
}
  0x11   :  { %s614_s22 = smov 128   ;;  %s615_s23 = smov 8  }
  0x12   :  { %23 = dma.hbm_to_vmem [thread:$0]  %s712_s1, 512, %s18_s13, [#allocation5], %s614_s22, %s614_s22, %s615_s23  }
  0x13   :  { %s616_s26 = smov [#allocation7]   ;;  %s563_s30 = scalar_lea.hbm %s713_s2, 2048 }
  0x14   :  { %s29_s27 = sshll.u32 %s616_s26, 4  ;;  %p564_p8 = scmp.ne.s32.totalorder %s713_s2, %s563_s30  ;;  %s30_s27 = int_to_ptr.vmem [resolvable:$true] %s29_s27 }
  0x15   :  { %p567_p9 = scmp.lt.u32.totalorder %s563_s30, %s713_s2 }
  0x17   :  { %p569_p10 = pnand %p567_p9, %p564_p8 }
  0x19   :  { %572 = shalt.err (!%p569_p10)
}
  0x1a   :  { %s573_s8 = scalar_lea.vmem %s30_s27, 2048  ;;  %p578_p12 = scmp.lt.s32.totalorder %s30_s27, %s30_s27 }
  0x1b   :  { %p574_p11 = scmp.ne.s32.totalorder %s30_s27, %s573_s8  ;;  %p579_p13 = scmp.lt.s32.totalorder %s573_s8, %s573_s8 }
  0x1d   :  { %p580_p0 = por %p579_p13, %p578_p12 }
  0x1f   :  { %p581_p1 = pnand %p580_p0, %p574_p11 }
  0x21   :  { %584 = shalt.err (!%p581_p1)
}
  0x22   :  { %s617_s1 = smov 64   ;;  %s618_s9 = smov 4  }
  0x23   :  { %35 = dma.hbm_to_vmem [thread:$0]  %s713_s2, 2048, %s30_s27, [#allocation8], %s617_s1, %s617_s1, %s618_s9  }
  0x24   :  { %607 = dma.done.wait [#allocation5], 512  }
  0x25   :  { %608 = vsyncadd [#allocation5], 4294966784 }
  0x26   :  { %609 = dma.done.wait [#allocation8], 2048  }
  0x27   :  { %610 = vsyncadd [#allocation8], 4294965248  ;;  %v525_v0 = vld [vmem:[#allocation7] sm:$0xff]   ;;  %v526_v1 = vld [vmem:[#allocation7 + $0x8] sm:$0xff]   ;;  %v44_v22 = vlaneseq  ;;  %s192_s13 = smul.u32 2246822507, %s711_s0 }
  0x28   :  { %478 = vmatprep.subr.bf16.mxu0 %v525_v0  ;;  %v527_v2 = vld [vmem:[#allocation7 + $0x10] sm:$0xff]   ;;  %v528_v3 = vld [vmem:[#allocation7 + $0x18] sm:$0xff]   ;;  %v65_v4 = vld [vmem:[#allocation4] sm:$0xff]  ;;  %s619_s0 = smov [#allocation9]  }
  0x29   :  { %479 = vmatpush3.bf16.msra.mxu0 %v525_v0  ;;  %v66_v5 = vld [vmem:[#allocation4 + $0x8] sm:$0xff]  ;;  %v533_v7 = vld [vmem:[#allocation7 + $0x40] sm:$0xff]   ;;  %v535_v10 = vld [vmem:[#allocation7 + $0x50] sm:$0xff]   ;;  %v45_v23 = vshrl.u32 %v44_v22, 7  ;;  %v50_v27 = vand.u32 127, %v44_v22  ;;  %v680_v38 = vstv %s192_s13  ;;  %s423_s14 = sshll.u32 %s619_s0, 4  ;;  %s424_s14 = int_to_ptr.vmem [resolvable:$true] %s423_s14 }
  0x2a   :  { %480 = vmatprep.subr.bf16.mxu0 %v526_v1  ;;  %v69_v6 = vpack.c.bf16 %v66_v5, %v65_v4  ;;  %v534_v8 = vld [vmem:[#allocation7 + $0x48] sm:$0xff]   ;;  %v529_v9 = vld [vmem:[#allocation7 + $0x20] sm:$0xff]   ;;  %498 = vmatprep.subr.bf16.mxu1 %v533_v7  ;;  %v536_v12 = vld [vmem:[#allocation7 + $0x58] sm:$0xff]   ;;  %s585_s15 = scalar_lea.vmem %s424_s14, 512  ;;  %p590_p3 = scmp.lt.s32.totalorder %s424_s14, %s424_s14 }
  0x2b   :  { %499 = vmatpush3.bf16.msra.mxu1 %v533_v7  ;;  %v530_v11 = vld [vmem:[#allocation7 + $0x28] sm:$0xff]   ;;  %v531_v13 = vld [vmem:[#allocation7 + $0x30] sm:$0xff]   ;;  %v537_v14 = vld [vmem:[#allocation7 + $0x60] sm:$0xff]   ;;  %v46_v24 = vadd.s32 8, %v45_v23  ;;  %v47_v25 = vadd.s32 16, %v45_v23  ;;  %v48_v26 = vadd.s32 24, %v45_v23  ;;  %p586_p2 = scmp.ne.s32.totalorder %s424_s14, %s585_s15  ;;  %p591_p4 = scmp.lt.s32.totalorder %s585_s15, %s585_s15 }
  0x2c   :  { %494 = vmatprep.mubr.bf16.mxu0 %v69_v6  ;;  %500 = vmatprep.subr.bf16.mxu1 %v534_v8  ;;  %v532_v15 = vld [vmem:[#allocation7 + $0x38] sm:$0xff]   ;;  %v538_v16 = vld [vmem:[#allocation7 + $0x68] sm:$0xff]   ;;  %v67_v17 = vld [vmem:[#allocation4 + $0x10] sm:$0xff]  ;;  %v57_v28 = vmul.u32 128, %v45_v23 }
  0x2d   :  { %481 = vmatpush3.bf16.msra.mxu0 %v526_v1  ;;  %v68_v18 = vld [vmem:[#allocation4 + $0x18] sm:$0xff]  ;;  %v539_v20 = vld [vmem:[#allocation7 + $0x70] sm:$0xff]   ;;  %v58_v29 = vmul.u32 128, %v46_v24  ;;  %v59_v30 = vmul.u32 128, %v47_v25  ;;  %p592_p5 = por %p591_p4, %p590_p3 }
  0x2e   :  { %482 = vmatprep.subr.bf16.mxu0 %v527_v2  ;;  %v70_v19 = vpack.c.bf16 %v68_v18, %v67_v17  ;;  %v540_v21 = vld [vmem:[#allocation7 + $0x78] sm:$0xff]   ;;  %v60_v31 = vmul.u32 128, %v48_v26  ;;  %v667_v32 = vadd.s32 %v57_v28, %v50_v27 }
  0x2f   :  { %501 = vmatpush3.bf16.msra.mxu1 %v534_v8  ;;  %v669_v33 = vadd.s32 %v58_v29, %v50_v27  ;;  %v674_v34 = vadd.s32 %v59_v30, %v50_v27  ;;  %p593_p6 = pnand %p592_p5, %p586_p2 }
  0x30   :  { %502 = vmatprep.subr.bf16.mxu1 %v535_v10  ;;  %v676_v35 = vadd.s32 %v60_v31, %v50_v27  ;;  %v188_v36 = vxor.u32 2654435761, %v667_v32  ;;  %v362_v28 = vxor.u32 1013904226, %v667_v32 }
  0x31   :  { %483 = vmatpush3.bf16.msra.mxu0 %v527_v2  ;;  %v189_v37 = vxor.u32 2654435761, %v669_v33  ;;  %v190_v39 = vxor.u32 2654435761, %v674_v34  ;;  %v364_v27 = vxor.u32 1013904226, %v674_v34 }
  0x32   :  { %484 = vmatprep.subr.bf16.mxu0 %v528_v3  ;;  %v191_v40 = vxor.u32 2654435761, %v676_v35  ;;  %v194_v41 = vxor.u32 %v680_v38, %v188_v36  ;;  %v365_v29 = vxor.u32 1013904226, %v676_v35  ;;  %v363_v30 = vxor.u32 1013904226, %v669_v33 }
  0x33   :  { %503 = vmatpush3.bf16.msra.mxu1 %v535_v10  ;;  %v195_v42 = vxor.u32 %v680_v38, %v189_v37  ;;  %v196_v43 = vxor.u32 %v680_v38, %v190_v39  ;;  %v368_v31 = vxor.u32 %v364_v27, %v680_v38  ;;  %v366_v36 = vxor.u32 %v362_v28, %v680_v38 }
  0x34   :  { %504 = vmatprep.subr.bf16.mxu1 %v536_v12  ;;  %v197_v44 = vxor.u32 %v680_v38, %v191_v40  ;;  %v198_v45 = vshrl.u32 %v194_v41, 16  ;;  %v369_v37 = vxor.u32 %v365_v29, %v680_v38  ;;  %v367_v39 = vxor.u32 %v363_v30, %v680_v38 }
  0x35   :  { %485 = vmatpush3.bf16.msra.mxu0 %v528_v3  ;;  %v199_v46 = vshrl.u32 %v195_v42, 16  ;;  %v200_v47 = vshrl.u32 %v196_v43, 16  ;;  %v372_v40 = vshrl.u32 %v368_v31, 16 }
  0x36   :  { %486 = vmatprep.subr.bf16.mxu0 %v529_v9  ;;  %v201_v48 = vshrl.u32 %v197_v44, 16  ;;  %v202_v49 = vxor.u32 %v198_v45, %v194_v41  ;;  %v370_v41 = vshrl.u32 %v366_v36, 16 }
  0x37   :  { %505 = vmatpush3.bf16.msra.mxu1 %v536_v12  ;;  %v203_v50 = vxor.u32 %v199_v46, %v195_v42  ;;  %v204_v51 = vxor.u32 %v200_v47, %v196_v43  ;;  %v373_v42 = vshrl.u32 %v369_v37, 16  ;;  %v371_v43 = vshrl.u32 %v367_v39, 16 }
  0x38   :  { %506 = vmatprep.subr.bf16.mxu1 %v537_v14  ;;  %v205_v52 = vxor.u32 %v201_v48, %v197_v44  ;;  %v206_v53 = vmul.u32 2146121005, %v202_v49  ;;  %v376_v44 = vxor.u32 %v372_v40, %v368_v31  ;;  %v374_v34 = vxor.u32 %v370_v41, %v366_v36 }
  0x39   :  { %487 = vmatpush3.bf16.msra.mxu0 %v529_v9  ;;  %v207_v54 = vmul.u32 2146121005, %v203_v50  ;;  %v208_v55 = vmul.u32 2146121005, %v204_v51  ;;  %v377_v45 = vxor.u32 %v373_v42, %v369_v37  ;;  %v375_v32 = vxor.u32 %v371_v43, %v367_v39 }
  0x3a   :  { %488 = vmatprep.subr.bf16.mxu0 %v530_v11  ;;  %v209_v56 = vmul.u32 2146121005, %v205_v52  ;;  %v210_v57 = vshrl.u32 %v206_v53, 15  ;;  %v380_v46 = vmul.u32 2146121005, %v376_v44 }
  0x3b   :  { %507 = vmatpush3.bf16.msra.mxu1 %v537_v14  ;;  %v211_v58 = vshrl.u32 %v207_v54, 15  ;;  %v212_v59 = vshrl.u32 %v208_v55, 15  ;;  %v378_v35 = vmul.u32 2146121005, %v374_v34  ;;  %v381_v47 = vmul.u32 2146121005, %v377_v45 }
  0x3c   :  { %508 = vmatprep.subr.bf16.mxu1 %v538_v16  ;;  %v213_v60 = vshrl.u32 %v209_v56, 15  ;;  %v214_v61 = vxor.u32 %v210_v57, %v206_v53  ;;  %v379_v33 = vmul.u32 2146121005, %v375_v32  ;;  %v384_v48 = vshrl.u32 %v380_v46, 15 }
  0x3d   :  { %489 = vmatpush3.bf16.msra.mxu0 %v530_v11  ;;  %v215_v62 = vxor.u32 %v211_v58, %v207_v54  ;;  %v216_v63 = vxor.u32 %v212_v59, %v208_v55  ;;  %v382_v49 = vshrl.u32 %v378_v35, 15  ;;  %v385_v50 = vshrl.u32 %v381_v47, 15 }
  0x3e   :  { %490 = vmatprep.subr.bf16.mxu0 %v531_v13  ;;  %v217_v0 = vxor.u32 %v213_v60, %v209_v56  ;;  %v218_v1 = vmul.u32 2221713035, %v214_v61  ;;  %v383_v51 = vshrl.u32 %v379_v33, 15  ;;  %v388_v52 = vxor.u32 %v384_v48, %v380_v46 }
  0x3f   :  { %509 = vmatpush3.bf16.msra.mxu1 %v538_v16  ;;  %v219_v2 = vmul.u32 2221713035, %v215_v62  ;;  %v220_v3 = vmul.u32 2221713035, %v216_v63  ;;  %v386_v53 = vxor.u32 %v382_v49, %v378_v35  ;;  %v389_v54 = vxor.u32 %v385_v50, %v381_v47 }
  0x40   :  { %510 = vmatprep.subr.bf16.mxu1 %v539_v20  ;;  %v221_v4 = vmul.u32 2221713035, %v217_v0  ;;  %v222_v5 = vshrl.u32 %v218_v1, 16  ;;  %v387_v38 = vxor.u32 %v383_v51, %v379_v33  ;;  %v392_v55 = vmul.u32 2221713035, %v388_v52 }
  0x41   :  { %491 = vmatpush3.bf16.msra.mxu0 %v531_v13  ;;  %v223_v6 = vshrl.u32 %v219_v2, 16  ;;  %v224_v7 = vshrl.u32 %v220_v3, 16  ;;  %v390_v56 = vmul.u32 2221713035, %v386_v53  ;;  %v393_v57 = vmul.u32 2221713035, %v389_v54 }
  0x42   :  { %492 = vmatprep.subr.bf16.mxu0 %v532_v15  ;;  %v225_v8 = vshrl.u32 %v221_v4, 16  ;;  %v226_v9 = vxor.u32 %v222_v5, %v218_v1  ;;  %v391_v58 = vmul.u32 2221713035, %v387_v38  ;;  %v396_v59 = vshrl.u32 %v392_v55, 16 }
  0x43   :  { %511 = vmatpush3.bf16.msra.mxu1 %v539_v20  ;;  %v227_v10 = vxor.u32 %v223_v6, %v219_v2  ;;  %v228_v11 = vxor.u32 %v224_v7, %v220_v3  ;;  %v394_v60 = vshrl.u32 %v390_v56, 16  ;;  %v397_v61 = vshrl.u32 %v393_v57, 16 }
  0x44   :  { %512 = vmatprep.subr.bf16.mxu1 %v540_v21  ;;  %v229_v12 = vxor.u32 %v225_v8, %v221_v4  ;;  %v230_v13 = vand.u32 1, %v226_v9  ;;  %v395_v62 = vshrl.u32 %v391_v58, 16  ;;  %v400_v63 = vxor.u32 %v396_v59, %v392_v55 }
  0x45   :  { %493 = vmatpush3.bf16.msra.mxu0 %v532_v15  ;;  %v231_v14 = vand.u32 1, %v227_v10  ;;  %v232_v15 = vand.u32 1, %v228_v11  ;;  %v398_v0 = vxor.u32 %v394_v60, %v390_v56  ;;  %v401_v1 = vxor.u32 %v397_v61, %v393_v57 }
  0x46   :  { %v233_v16 = vand.u32 1, %v229_v12  ;;  %vm234_vm0 = vcmp.eq.s32.totalorder %v230_v13, 1  ;;  %v399_v2 = vxor.u32 %v395_v62, %v391_v58  ;;  %v404_v3 = vand.u32 1, %v400_v63 }
  0x47   :  { %513 = vmatpush3.bf16.msra.mxu1 %v540_v21  ;;  %vm235_vm1 = vcmp.eq.s32.totalorder %v231_v14, 1  ;;  %vm236_vm2 = vcmp.eq.s32.totalorder %v232_v15, 1  ;;  %v402_v4 = vand.u32 1, %v398_v0  ;;  %v405_v5 = vand.u32 1, %v401_v1 }
  0x48   :  { %495 = vmatmul.mubr.bf16.vlgmr.msra.gmra.mrb[0].mxu0 %v70_v19  ;;  %vm237_vm3 = vcmp.eq.s32.totalorder %v233_v16, 1  ;;  %vm452_vm4 = vmpackc.low %vm235_vm1, %vm234_vm0  ;;  %v403_v6 = vand.u32 1, %v399_v2  ;;  %vm408_vm6 = vcmp.eq.s32.totalorder %v404_v3, 1 }
  0x49   :  { %vm455_vm5 = vmpackc.low %vm237_vm3, %vm236_vm2  ;;  %vm406_vm7 = vcmp.eq.s32.totalorder %v402_v4, 1  ;;  %vm409_vm8 = vcmp.eq.s32.totalorder %v405_v5, 1 }
  0x4a   :  { %vm407_vm9 = vcmp.eq.s32.totalorder %v403_v6, 1 }
 0x11b   :  { %v496_v17 = vpop.f32.mrb[0].mxu0 }
 0x11c   :  { %v169_v18 = vpop.f32.mrb[1].mxu0  ;;  %v186_v20 = vmax.f32 %v496_v17, 0.0 }
 0x11d   :  { %v497_v19 = vpop.f32.mrb[2].mxu0  ;;  %v184_v23 = vmax.f32 %v169_v18, 0.0 }
 0x11e   :  { %v187_v21 = vmax.f32 %v497_v19, 0.0  ;;  %v172_v22 = vpop.f32.mrb[3].mxu0 }
 0x11f   :  { %v185_v24 = vmax.f32 %v172_v22, 0.0 }
 0x120   :  { %v456_v25 = vpack.c.bf16 %v187_v21, %v186_v20 }
 0x121   :  { %v453_v26 = vpack.c.bf16 %v185_v24, %v184_v23 }
 0x123   :  { %514 = vmatprep.mubr.msk.bf16.mxu1 %vm452_vm4, %v453_v26 }
 0x124   :  { %515 = vmatmul.mubr.msk.bf16.vlgmr.msra.gmra.mrb[0].mxu1 %vm455_vm5, %v456_v25 }
 0x1f7   :  { %v516_v7 = vpop.f32.mrb[0].mxu1 }
 0x1f8   :  { %v360_v8 = vmax.f32 %v516_v7, 0.0  ;;  %v343_v9 = vpop.f32.mrb[1].mxu1 }
 0x1f9   :  { %v358_v10 = vmax.f32 %v343_v9, 0.0  ;;  %v517_v11 = vpop.f32.mrb[2].mxu1 }
 0x1fa   :  { %v412_v12 = vsel %vm408_vm6, %v360_v8, 0.0  ;;  %v361_v13 = vmax.f32 %v517_v11, 0.0  ;;  %v346_v14 = vpop.f32.mrb[3].mxu1 }
 0x1fb   :  { %416 = vst [vmem:[#allocation9 + $0x10] sm:$0xff] %v412_v12  ;;  %v410_v15 = vsel %vm406_vm7, %v358_v10, 0.0  ;;  %v359_v16 = vmax.f32 %v346_v14, 0.0 }
 0x1fc   :  { %414 = vst [vmem:[#allocation9] sm:$0xff] %v410_v15  ;;  %v413_v17 = vsel %vm409_vm8, %v361_v13, 0.0 }
 0x1fd   :  { %417 = vst [vmem:[#allocation9 + $0x18] sm:$0xff] %v413_v17  ;;  %v411_v18 = vsel %vm407_vm9, %v359_v16, 0.0 }
 0x1fe   :  { %415 = vst [vmem:[#allocation9 + $0x8] sm:$0xff] %v411_v18 }
 0x1ff   :  { %596 = shalt.err (!%p593_p6)
}
 0x200   :  { %s597_s18 = scalar_lea.hbm %s714_s3, 512 }
 0x201   :  { %p598_p7 = scmp.ne.s32.totalorder %s714_s3, %s597_s18  ;;  %p601_p8 = scmp.lt.u32.totalorder %s597_s18, %s714_s3 }
 0x203   :  { %p603_p9 = pnand %p601_p8, %p598_p7 }
 0x205   :  { %606 = shalt.err (!%p603_p9)
}
 0x206   :  { %429 = dma.vmem_to_hbm [thread:$0]  %s424_s14, 512, %s714_s3, [#allocation6], %s614_s22, %s614_s22, %s615_s23  }
 0x207   :  { %611 = dma.done.wait [#allocation6], 512  }
 0x208   :  { %612 = vsyncadd [#allocation6], 4294966784 }
 0x209   :  { %433 = vsyncpa [#allocation5], 1 }
 0x20a   :  { %434 = vsyncpa [#allocation8], 1 }
 0x20b   :  { %435 = vsyncpa [#allocation6], 1 }

</bundles_post_ra>
